<compile_context>
chip_gen: v6e
topology: v6e:2x2x1
jax: 0.10.0
libtpu: 0.0.40
codegen_flags: <defaults>
</compile_context>

<pallas_src>
import functools

import jax
import jax.numpy as jnp
from jax import lax
from jax.experimental import pallas as pl
from jax.experimental.pallas import tpu as pltpu

CIN = 128
COUT = 3
KH = KW = 3
GROUP = 8                      # sublane-aligned rows per tap group
W_ROWS = KH * KW * GROUP       # 72 weight rows (9 taps * 8 rows)


def _lane_shift(v, off):
    """v[..., j] -> v[..., (j + off) % n] for a static integer offset (cyclic)."""
    n = v.shape[-1]
    k = off % n
    if k == 0:
        return v
    return jnp.concatenate([v[..., k:], v[..., :k]], axis=-1)


def conv3x3_kernel(x_ref, w_ref, o_ref, *, H, W, bb):
    # x_ref: (bb, CIN, H*W)   raw NCHW image(s), flattened spatially (no padding)
    # w_ref: (72, CIN)        row 8*t + c = weight[c, :, kh, kw], t = 3*kh + kw
    # o_ref: (bb, 8, H*W)     rows 0..2 = conv channels, rows 3..7 stay zero
    HW = H * W

    # Edge-validity masks over flattened output index j = h*W + w (hoisted).
    j = lax.broadcasted_iota(jnp.int32, (GROUP, HW), 1)
    col = jnp.remainder(j, W)
    valid_top = j >= W               # taps with kh == 0 need h >= 1
    valid_bot = j < (H - 1) * W      # taps with kh == 2 need h <= H-2
    valid_left = col != 0            # taps with kw == 0 need w >= 1
    valid_right = col != W - 1       # taps with kw == 2 need w <= W-2

    w_all = w_ref[...]               # (72, CIN), resident across the image loop

    for b in range(bb):              # static per-block image loop (collapsed grid)
        # One MXU matmul covers all 9 taps and every output pixel of image b.
        y = jnp.dot(w_all, x_ref[b], preferred_element_type=jnp.float32)  # (72, HW)

        taps = []
        for t in range(KH * KW):
            kh, kw = divmod(t, KW)
            # Output pixel j uses the tap-t projection of input pixel j + off.
            off = (kh - 1) * W + (kw - 1)
            tap = _lane_shift(y[GROUP * t:GROUP * (t + 1), :], off)   # (8, HW)
            masks = []
            if kh == 0:
                masks.append(valid_top)
            if kh == 2:
                masks.append(valid_bot)
            if kw == 0:
                masks.append(valid_left)
            if kw == 2:
                masks.append(valid_right)
            if masks:
                m = masks[0]
                for extra in masks[1:]:
                    m = m & extra
                tap = jnp.where(m, tap, 0.0)
            taps.append(tap)

        # Pairwise (tree) reduction: 4 dependency levels instead of 8 serial adds.
        while len(taps) > 1:
            nxt = [taps[i] + taps[i + 1] for i in range(0, len(taps) - 1, 2)]
            if len(taps) % 2:
                nxt.append(taps[-1])
            taps = nxt

        # Dense, unmasked (8, HW) store; rows 3..7 are exactly zero by
        # construction (zero weight rows), the wrapper slices them away.
        o_ref[b] = taps[0].astype(o_ref.dtype)


def _pick_images_per_block(batch, bytes_per_image, vmem_budget=8 << 20):
    """Largest divisor of `batch` whose (double-buffered) block fits the budget."""
    bb = max(1, min(batch, vmem_budget // (2 * max(bytes_per_image, 1))))
    while batch % bb:
        bb -= 1
    return bb


def conv_out_pallas(x_nchw, weight, bias):
    """x_nchw: (B, 128, H, W); weight: (3, 128, 3, 3); bias: (3,)."""
    B, Cin, H, W = x_nchw.shape
    assert Cin == CIN
    HW = H * W
    itemsize = x_nchw.dtype.itemsize

    # Free (contiguous) reshape — no extra HBM pass, no transpose.
    x_flat = x_nchw.reshape(B, CIN, HW)

    # Weight: OIHW (3,128,3,3) -> sublane-aligned rows 8*t + c, Cin minor.
    w_tap = jnp.transpose(weight, (2, 3, 0, 1)).reshape(KH * KW, COUT, CIN)
    w_rows = jnp.pad(w_tap, ((0, 0), (0, GROUP - COUT), (0, 0))).reshape(W_ROWS, CIN)

    bb = _pick_images_per_block(B, CIN * HW * itemsize)
    grid = (B // bb,)

    kernel = functools.partial(conv3x3_kernel, H=H, W=W, bb=bb)
    cost = pl.CostEstimate(
        flops=2 * B * W_ROWS * CIN * HW,
        transcendentals=0,
        bytes_accessed=(B * CIN * HW * itemsize
                        + W_ROWS * CIN * weight.dtype.itemsize
                        + B * GROUP * HW * itemsize),
    )

    out_pad = pl.pallas_call(
        kernel,
        out_shape=jax.ShapeDtypeStruct((B, GROUP, HW), x_nchw.dtype),
        grid_spec=pltpu.PrefetchScalarGridSpec(
            num_scalar_prefetch=0,
            grid=grid,
            in_specs=[
                pl.BlockSpec((bb, CIN, HW), lambda g: (g, 0, 0)),
                pl.BlockSpec((W_ROWS, CIN), lambda g: (0, 0)),
            ],
            out_specs=pl.BlockSpec((bb, GROUP, HW), lambda g: (g, 0, 0)),
        ),
        compiler_params=pltpu.CompilerParams(
            dimension_semantics=("parallel",)),
        cost_estimate=cost,
    )(x_flat, w_rows)

    # Drop the 5 zero padding rows, restore (B, 3, H, W), fold the bias (tiny).
    out = out_pad[:, :COUT, :].reshape(B, COUT, H, W)
    return out + bias.reshape(1, COUT, 1, 1).astype(out.dtype)


def reference_conv(x_nchw, weight, bias):
    out = lax.conv_general_dilated(
        x_nchw, weight, window_strides=(1, 1), padding=((1, 1), (1, 1)),
        dimension_numbers=("NCHW", "OIHW", "NCHW"))
    return out + bias.reshape(1, COUT, 1, 1)


if __name__ == "__main__":
    key = jax.random.PRNGKey(0)
    k_x, k_w, k_b = jax.random.split(key, 3)

    B, H, W = 2, 16, 16
    x = jax.random.normal(k_x, (B, CIN, H, W), dtype=jnp.float32)

    # Deterministic parameter init (matches PyTorch Conv2d parameter shapes).
    fan_in = CIN * KH * KW
    bound = 1.0 / (fan_in ** 0.5)
    weight = jax.random.uniform(k_w, (COUT, CIN, KH, KW),
                                minval=-bound, maxval=bound, dtype=jnp.float32)
    bias = jax.random.uniform(k_b, (COUT,),
                              minval=-bound, maxval=bound, dtype=jnp.float32)

    conv_fn = jax.jit(conv_out_pallas)
    out = jax.block_until_ready(conv_fn(x, weight, bias))
    ref = jax.block_until_ready(reference_conv(x, weight, bias))

    assert out.shape == (B, COUT, H, W)
    assert jnp.allclose(out, ref, atol=2e-4, rtol=2e-4), "mismatch vs XLA conv"

    print("KERNEL_OK")
</pallas_src>

<mosaic_0001>
module attributes {stable_mosaic.version = 11 : i64} {
  func.func @conv3x3_kernel(%arg0: i32, %arg1: memref<2x128x256xf32, #tpu.memory_space<vmem>>, %arg2: memref<72x128xf32, #tpu.memory_space<vmem>>, %arg3: memref<2x8x256xf32, #tpu.memory_space<vmem>>) attributes {dimension_semantics = [#tpu.dimension_semantics<parallel>], iteration_bounds = array<i64: 1>, scalar_prefetch = 0 : i64, scratch_operands = 0 : i64, tpu.core_type = #tpu.core_type<tc>, window_params = [{transform_indices = @transform_0, window_bounds = array<i64: 2, 128, 256>}, {pipeline_mode = #tpu.pipeline_mode<synchronous>, transform_indices = @transform_1, window_bounds = array<i64: 72, 128>}, {transform_indices = @transform_2, window_bounds = array<i64: 2, 8, 256>}]} {
    %0 = tpu.iota {dimensions = array<i32: 1>} : vector<8x256xi32>
    %c16_i32 = arith.constant 16 : i32
    %c0_i32 = arith.constant 0 : i32
    %1 = arith.cmpi eq, %c16_i32, %c0_i32 : i32
    %c1_i32 = arith.constant 1 : i32
    %2 = arith.select %1, %c1_i32, %c16_i32 : i32
    %3 = vector.broadcast %2 : i32 to vector<8x256xi32>
    %4 = arith.remsi %0, %3 : vector<8x256xi32>
    %c0_i32_0 = arith.constant 0 : i32
    %5 = vector.broadcast %c0_i32_0 : i32 to vector<8x256xi32>
    %6 = arith.cmpi ne, %4, %5 : vector<8x256xi32>
    %c0_i32_1 = arith.constant 0 : i32
    %7 = vector.broadcast %c0_i32_1 : i32 to vector<8x256xi32>
    %8 = arith.cmpi slt, %4, %7 : vector<8x256xi32>
    %c0_i32_2 = arith.constant 0 : i32
    %9 = arith.cmpi slt, %2, %c0_i32_2 : i32
    %10 = vector.broadcast %9 : i1 to vector<8x256xi1>
    %11 = vector.broadcast %10 : vector<8x256xi1> to vector<8x256xi1>
    %12 = arith.xori %8, %11 : vector<8x256xi1>
    %13 = arith.andi %12, %6 : vector<8x256xi1>
    %14 = vector.broadcast %2 : i32 to vector<8x256xi32>
    %15 = arith.addi %4, %14 : vector<8x256xi32>
    %16 = arith.select %13, %15, %4 : vector<8x256xi1>, vector<8x256xi32>
    %c16_i32_3 = arith.constant 16 : i32
    %17 = vector.broadcast %c16_i32_3 : i32 to vector<8x256xi32>
    %18 = arith.cmpi sge, %0, %17 : vector<8x256xi32>
    %c240_i32 = arith.constant 240 : i32
    %19 = vector.broadcast %c240_i32 : i32 to vector<8x256xi32>
    %20 = arith.cmpi slt, %0, %19 : vector<8x256xi32>
    %c0_i32_4 = arith.constant 0 : i32
    %21 = vector.broadcast %c0_i32_4 : i32 to vector<8x256xi32>
    %22 = arith.cmpi ne, %16, %21 : vector<8x256xi32>
    %c15_i32 = arith.constant 15 : i32
    %23 = vector.broadcast %c15_i32 : i32 to vector<8x256xi32>
    %24 = arith.cmpi ne, %16, %23 : vector<8x256xi32>
    %c0 = arith.constant 0 : index
    %c0_5 = arith.constant 0 : index
    %25 = vector.load %arg2[%c0, %c0_5] : memref<72x128xf32, #tpu.memory_space<vmem>>, vector<72x128xf32>
    %c0_6 = arith.constant 0 : index
    %c0_7 = arith.constant 0 : index
    %c0_8 = arith.constant 0 : index
    %26 = vector.load %arg1[%c0_6, %c0_7, %c0_8] : memref<2x128x256xf32, #tpu.memory_space<vmem>>, vector<1x128x256xf32>
    %27 = vector.shape_cast %26 : vector<1x128x256xf32> to vector<128x256xf32>
    %cst = arith.constant dense<0.000000e+00> : vector<72x256xf32>
    %28 = tpu.matmul %25, %27, %cst {dimension_numbers = #tpu.dot_dimension_numbers<[1], [0], [0], [1], [0, 0, 1, 1], [], []>} : vector<72x128xf32>, vector<128x256xf32>, vector<72x256xf32> -> vector<72x256xf32>
    %29 = vector.extract_strided_slice %28 {offsets = [0, 0], sizes = [8, 256], strides = [1, 1]} : vector<72x256xf32> to vector<8x256xf32>
    %30 = vector.extract_strided_slice %29 {offsets = [0, 239], sizes = [8, 17], strides = [1, 1]} : vector<8x256xf32> to vector<8x17xf32>
    %31 = vector.extract_strided_slice %29 {offsets = [0, 0], sizes = [8, 239], strides = [1, 1]} : vector<8x256xf32> to vector<8x239xf32>
    %32 = tpu.concatenate %30, %31 in 1 : vector<8x17xf32>, vector<8x239xf32> -> vector<8x256xf32>
    %33 = arith.andi %18, %22 : vector<8x256xi1>
    %cst_9 = arith.constant 0.000000e+00 : f32
    %34 = vector.broadcast %cst_9 : f32 to vector<8x256xf32>
    %35 = arith.select %33, %32, %34 : vector<8x256xi1>, vector<8x256xf32>
    %36 = vector.extract_strided_slice %28 {offsets = [8, 0], sizes = [8, 256], strides = [1, 1]} : vector<72x256xf32> to vector<8x256xf32>
    %37 = vector.extract_strided_slice %36 {offsets = [0, 240], sizes = [8, 16], strides = [1, 1]} : vector<8x256xf32> to vector<8x16xf32>
    %38 = vector.extract_strided_slice %36 {offsets = [0, 0], sizes = [8, 240], strides = [1, 1]} : vector<8x256xf32> to vector<8x240xf32>
    %39 = tpu.concatenate %37, %38 in 1 : vector<8x16xf32>, vector<8x240xf32> -> vector<8x256xf32>
    %cst_10 = arith.constant 0.000000e+00 : f32
    %40 = vector.broadcast %cst_10 : f32 to vector<8x256xf32>
    %41 = arith.select %18, %39, %40 : vector<8x256xi1>, vector<8x256xf32>
    %42 = vector.extract_strided_slice %28 {offsets = [16, 0], sizes = [8, 256], strides = [1, 1]} : vector<72x256xf32> to vector<8x256xf32>
    %43 = vector.extract_strided_slice %42 {offsets = [0, 241], sizes = [8, 15], strides = [1, 1]} : vector<8x256xf32> to vector<8x15xf32>
    %44 = vector.extract_strided_slice %42 {offsets = [0, 0], sizes = [8, 241], strides = [1, 1]} : vector<8x256xf32> to vector<8x241xf32>
    %45 = tpu.concatenate %43, %44 in 1 : vector<8x15xf32>, vector<8x241xf32> -> vector<8x256xf32>
    %46 = arith.andi %18, %24 : vector<8x256xi1>
    %cst_11 = arith.constant 0.000000e+00 : f32
    %47 = vector.broadcast %cst_11 : f32 to vector<8x256xf32>
    %48 = arith.select %46, %45, %47 : vector<8x256xi1>, vector<8x256xf32>
    %49 = vector.extract_strided_slice %28 {offsets = [24, 0], sizes = [8, 256], strides = [1, 1]} : vector<72x256xf32> to vector<8x256xf32>
    %50 = vector.extract_strided_slice %49 {offsets = [0, 255], sizes = [8, 1], strides = [1, 1]} : vector<8x256xf32> to vector<8x1xf32>
    %51 = vector.extract_strided_slice %49 {offsets = [0, 0], sizes = [8, 255], strides = [1, 1]} : vector<8x256xf32> to vector<8x255xf32>
    %52 = tpu.concatenate %50, %51 in 1 : vector<8x1xf32>, vector<8x255xf32> -> vector<8x256xf32>
    %cst_12 = arith.constant 0.000000e+00 : f32
    %53 = vector.broadcast %cst_12 : f32 to vector<8x256xf32>
    %54 = arith.select %22, %52, %53 : vector<8x256xi1>, vector<8x256xf32>
    %55 = vector.extract_strided_slice %28 {offsets = [32, 0], sizes = [8, 256], strides = [1, 1]} : vector<72x256xf32> to vector<8x256xf32>
    %56 = vector.extract_strided_slice %28 {offsets = [40, 0], sizes = [8, 256], strides = [1, 1]} : vector<72x256xf32> to vector<8x256xf32>
    %57 = vector.extract_strided_slice %56 {offsets = [0, 1], sizes = [8, 255], strides = [1, 1]} : vector<8x256xf32> to vector<8x255xf32>
    %58 = vector.extract_strided_slice %56 {offsets = [0, 0], sizes = [8, 1], strides = [1, 1]} : vector<8x256xf32> to vector<8x1xf32>
    %59 = tpu.concatenate %57, %58 in 1 : vector<8x255xf32>, vector<8x1xf32> -> vector<8x256xf32>
    %cst_13 = arith.constant 0.000000e+00 : f32
    %60 = vector.broadcast %cst_13 : f32 to vector<8x256xf32>
    %61 = arith.select %24, %59, %60 : vector<8x256xi1>, vector<8x256xf32>
    %62 = vector.extract_strided_slice %28 {offsets = [48, 0], sizes = [8, 256], strides = [1, 1]} : vector<72x256xf32> to vector<8x256xf32>
    %63 = vector.extract_strided_slice %62 {offsets = [0, 15], sizes = [8, 241], strides = [1, 1]} : vector<8x256xf32> to vector<8x241xf32>
    %64 = vector.extract_strided_slice %62 {offsets = [0, 0], sizes = [8, 15], strides = [1, 1]} : vector<8x256xf32> to vector<8x15xf32>
    %65 = tpu.concatenate %63, %64 in 1 : vector<8x241xf32>, vector<8x15xf32> -> vector<8x256xf32>
    %66 = arith.andi %20, %22 : vector<8x256xi1>
    %cst_14 = arith.constant 0.000000e+00 : f32
    %67 = vector.broadcast %cst_14 : f32 to vector<8x256xf32>
    %68 = arith.select %66, %65, %67 : vector<8x256xi1>, vector<8x256xf32>
    %69 = vector.extract_strided_slice %28 {offsets = [56, 0], sizes = [8, 256], strides = [1, 1]} : vector<72x256xf32> to vector<8x256xf32>
    %70 = vector.extract_strided_slice %69 {offsets = [0, 16], sizes = [8, 240], strides = [1, 1]} : vector<8x256xf32> to vector<8x240xf32>
    %71 = vector.extract_strided_slice %69 {offsets = [0, 0], sizes = [8, 16], strides = [1, 1]} : vector<8x256xf32> to vector<8x16xf32>
    %72 = tpu.concatenate %70, %71 in 1 : vector<8x240xf32>, vector<8x16xf32> -> vector<8x256xf32>
    %cst_15 = arith.constant 0.000000e+00 : f32
    %73 = vector.broadcast %cst_15 : f32 to vector<8x256xf32>
    %74 = arith.select %20, %72, %73 : vector<8x256xi1>, vector<8x256xf32>
    %75 = vector.extract_strided_slice %28 {offsets = [64, 0], sizes = [8, 256], strides = [1, 1]} : vector<72x256xf32> to vector<8x256xf32>
    %76 = vector.extract_strided_slice %75 {offsets = [0, 17], sizes = [8, 239], strides = [1, 1]} : vector<8x256xf32> to vector<8x239xf32>
    %77 = vector.extract_strided_slice %75 {offsets = [0, 0], sizes = [8, 17], strides = [1, 1]} : vector<8x256xf32> to vector<8x17xf32>
    %78 = tpu.concatenate %76, %77 in 1 : vector<8x239xf32>, vector<8x17xf32> -> vector<8x256xf32>
    %79 = arith.andi %20, %24 : vector<8x256xi1>
    %cst_16 = arith.constant 0.000000e+00 : f32
    %80 = vector.broadcast %cst_16 : f32 to vector<8x256xf32>
    %81 = arith.select %79, %78, %80 : vector<8x256xi1>, vector<8x256xf32>
    %82 = arith.addf %35, %41 : vector<8x256xf32>
    %83 = arith.addf %48, %54 : vector<8x256xf32>
    %84 = arith.addf %55, %61 : vector<8x256xf32>
    %85 = arith.addf %68, %74 : vector<8x256xf32>
    %86 = arith.addf %82, %83 : vector<8x256xf32>
    %87 = arith.addf %84, %85 : vector<8x256xf32>
    %88 = arith.addf %86, %87 : vector<8x256xf32>
    %89 = arith.addf %88, %81 : vector<8x256xf32>
    %c0_17 = arith.constant 0 : index
    %c0_18 = arith.constant 0 : index
    %c0_19 = arith.constant 0 : index
    %90 = vector.load %arg3[%c0_17, %c0_18, %c0_19] : memref<2x8x256xf32, #tpu.memory_space<vmem>>, vector<1x8x256xf32>
    %91 = vector.shape_cast %90 : vector<1x8x256xf32> to vector<8x256xf32>
    %92 = vector.shape_cast %89 : vector<8x256xf32> to vector<1x8x256xf32>
    tpu.vector_store %arg3[%c0_17, %c0_18, %c0_19], %92 {strides = array<i32>} : memref<2x8x256xf32, #tpu.memory_space<vmem>>, vector<1x8x256xf32>,
    %c1 = arith.constant 1 : index
    %c0_20 = arith.constant 0 : index
    %c0_21 = arith.constant 0 : index
    %93 = vector.load %arg1[%c1, %c0_20, %c0_21] : memref<2x128x256xf32, #tpu.memory_space<vmem>>, vector<1x128x256xf32>
    %94 = vector.shape_cast %93 : vector<1x128x256xf32> to vector<128x256xf32>
    %cst_22 = arith.constant dense<0.000000e+00> : vector<72x256xf32>
    %95 = tpu.matmul %25, %94, %cst_22 {dimension_numbers = #tpu.dot_dimension_numbers<[1], [0], [0], [1], [0, 0, 1, 1], [], []>} : vector<72x128xf32>, vector<128x256xf32>, vector<72x256xf32> -> vector<72x256xf32>
    %96 = vector.extract_strided_slice %95 {offsets = [0, 0], sizes = [8, 256], strides = [1, 1]} : vector<72x256xf32> to vector<8x256xf32>
    %97 = vector.extract_strided_slice %96 {offsets = [0, 239], sizes = [8, 17], strides = [1, 1]} : vector<8x256xf32> to vector<8x17xf32>
    %98 = vector.extract_strided_slice %96 {offsets = [0, 0], sizes = [8, 239], strides = [1, 1]} : vector<8x256xf32> to vector<8x239xf32>
    %99 = tpu.concatenate %97, %98 in 1 : vector<8x17xf32>, vector<8x239xf32> -> vector<8x256xf32>
    %100 = arith.andi %18, %22 : vector<8x256xi1>
    %cst_23 = arith.constant 0.000000e+00 : f32
    %101 = vector.broadcast %cst_23 : f32 to vector<8x256xf32>
    %102 = arith.select %100, %99, %101 : vector<8x256xi1>, vector<8x256xf32>
    %103 = vector.extract_strided_slice %95 {offsets = [8, 0], sizes = [8, 256], strides = [1, 1]} : vector<72x256xf32> to vector<8x256xf32>
    %104 = vector.extract_strided_slice %103 {offsets = [0, 240], sizes = [8, 16], strides = [1, 1]} : vector<8x256xf32> to vector<8x16xf32>
    %105 = vector.extract_strided_slice %103 {offsets = [0, 0], sizes = [8, 240], strides = [1, 1]} : vector<8x256xf32> to vector<8x240xf32>
    %106 = tpu.concatenate %104, %105 in 1 : vector<8x16xf32>, vector<8x240xf32> -> vector<8x256xf32>
    %cst_24 = arith.constant 0.000000e+00 : f32
    %107 = vector.broadcast %cst_24 : f32 to vector<8x256xf32>
    %108 = arith.select %18, %106, %107 : vector<8x256xi1>, vector<8x256xf32>
    %109 = vector.extract_strided_slice %95 {offsets = [16, 0], sizes = [8, 256], strides = [1, 1]} : vector<72x256xf32> to vector<8x256xf32>
    %110 = vector.extract_strided_slice %109 {offsets = [0, 241], sizes = [8, 15], strides = [1, 1]} : vector<8x256xf32> to vector<8x15xf32>
    %111 = vector.extract_strided_slice %109 {offsets = [0, 0], sizes = [8, 241], strides = [1, 1]} : vector<8x256xf32> to vector<8x241xf32>
    %112 = tpu.concatenate %110, %111 in 1 : vector<8x15xf32>, vector<8x241xf32> -> vector<8x256xf32>
    %113 = arith.andi %18, %24 : vector<8x256xi1>
    %cst_25 = arith.constant 0.000000e+00 : f32
    %114 = vector.broadcast %cst_25 : f32 to vector<8x256xf32>
    %115 = arith.select %113, %112, %114 : vector<8x256xi1>, vector<8x256xf32>
    %116 = vector.extract_strided_slice %95 {offsets = [24, 0], sizes = [8, 256], strides = [1, 1]} : vector<72x256xf32> to vector<8x256xf32>
    %117 = vector.extract_strided_slice %116 {offsets = [0, 255], sizes = [8, 1], strides = [1, 1]} : vector<8x256xf32> to vector<8x1xf32>
    %118 = vector.extract_strided_slice %116 {offsets = [0, 0], sizes = [8, 255], strides = [1, 1]} : vector<8x256xf32> to vector<8x255xf32>
    %119 = tpu.concatenate %117, %118 in 1 : vector<8x1xf32>, vector<8x255xf32> -> vector<8x256xf32>
    %cst_26 = arith.constant 0.000000e+00 : f32
    %120 = vector.broadcast %cst_26 : f32 to vector<8x256xf32>
    %121 = arith.select %22, %119, %120 : vector<8x256xi1>, vector<8x256xf32>
    %122 = vector.extract_strided_slice %95 {offsets = [32, 0], sizes = [8, 256], strides = [1, 1]} : vector<72x256xf32> to vector<8x256xf32>
    %123 = vector.extract_strided_slice %95 {offsets = [40, 0], sizes = [8, 256], strides = [1, 1]} : vector<72x256xf32> to vector<8x256xf32>
    %124 = vector.extract_strided_slice %123 {offsets = [0, 1], sizes = [8, 255], strides = [1, 1]} : vector<8x256xf32> to vector<8x255xf32>
    %125 = vector.extract_strided_slice %123 {offsets = [0, 0], sizes = [8, 1], strides = [1, 1]} : vector<8x256xf32> to vector<8x1xf32>
    %126 = tpu.concatenate %124, %125 in 1 : vector<8x255xf32>, vector<8x1xf32> -> vector<8x256xf32>
    %cst_27 = arith.constant 0.000000e+00 : f32
    %127 = vector.broadcast %cst_27 : f32 to vector<8x256xf32>
    %128 = arith.select %24, %126, %127 : vector<8x256xi1>, vector<8x256xf32>
    %129 = vector.extract_strided_slice %95 {offsets = [48, 0], sizes = [8, 256], strides = [1, 1]} : vector<72x256xf32> to vector<8x256xf32>
    %130 = vector.extract_strided_slice %129 {offsets = [0, 15], sizes = [8, 241], strides = [1, 1]} : vector<8x256xf32> to vector<8x241xf32>
    %131 = vector.extract_strided_slice %129 {offsets = [0, 0], sizes = [8, 15], strides = [1, 1]} : vector<8x256xf32> to vector<8x15xf32>
    %132 = tpu.concatenate %130, %131 in 1 : vector<8x241xf32>, vector<8x15xf32> -> vector<8x256xf32>
    %133 = arith.andi %20, %22 : vector<8x256xi1>
    %cst_28 = arith.constant 0.000000e+00 : f32
    %134 = vector.broadcast %cst_28 : f32 to vector<8x256xf32>
    %135 = arith.select %133, %132, %134 : vector<8x256xi1>, vector<8x256xf32>
    %136 = vector.extract_strided_slice %95 {offsets = [56, 0], sizes = [8, 256], strides = [1, 1]} : vector<72x256xf32> to vector<8x256xf32>
    %137 = vector.extract_strided_slice %136 {offsets = [0, 16], sizes = [8, 240], strides = [1, 1]} : vector<8x256xf32> to vector<8x240xf32>
    %138 = vector.extract_strided_slice %136 {offsets = [0, 0], sizes = [8, 16], strides = [1, 1]} : vector<8x256xf32> to vector<8x16xf32>
    %139 = tpu.concatenate %137, %138 in 1 : vector<8x240xf32>, vector<8x16xf32> -> vector<8x256xf32>
    %cst_29 = arith.constant 0.000000e+00 : f32
    %140 = vector.broadcast %cst_29 : f32 to vector<8x256xf32>
    %141 = arith.select %20, %139, %140 : vector<8x256xi1>, vector<8x256xf32>
    %142 = vector.extract_strided_slice %95 {offsets = [64, 0], sizes = [8, 256], strides = [1, 1]} : vector<72x256xf32> to vector<8x256xf32>
    %143 = vector.extract_strided_slice %142 {offsets = [0, 17], sizes = [8, 239], strides = [1, 1]} : vector<8x256xf32> to vector<8x239xf32>
    %144 = vector.extract_strided_slice %142 {offsets = [0, 0], sizes = [8, 17], strides = [1, 1]} : vector<8x256xf32> to vector<8x17xf32>
    %145 = tpu.concatenate %143, %144 in 1 : vector<8x239xf32>, vector<8x17xf32> -> vector<8x256xf32>
    %146 = arith.andi %20, %24 : vector<8x256xi1>
    %cst_30 = arith.constant 0.000000e+00 : f32
    %147 = vector.broadcast %cst_30 : f32 to vector<8x256xf32>
    %148 = arith.select %146, %145, %147 : vector<8x256xi1>, vector<8x256xf32>
    %149 = arith.addf %102, %108 : vector<8x256xf32>
    %150 = arith.addf %115, %121 : vector<8x256xf32>
    %151 = arith.addf %122, %128 : vector<8x256xf32>
    %152 = arith.addf %135, %141 : vector<8x256xf32>
    %153 = arith.addf %149, %150 : vector<8x256xf32>
    %154 = arith.addf %151, %152 : vector<8x256xf32>
    %155 = arith.addf %153, %154 : vector<8x256xf32>
    %156 = arith.addf %155, %148 : vector<8x256xf32>
    %c1_31 = arith.constant 1 : index
    %c0_32 = arith.constant 0 : index
    %c0_33 = arith.constant 0 : index
    %157 = vector.load %arg3[%c1_31, %c0_32, %c0_33] : memref<2x8x256xf32, #tpu.memory_space<vmem>>, vector<1x8x256xf32>
    %158 = vector.shape_cast %157 : vector<1x8x256xf32> to vector<8x256xf32>
    %159 = vector.shape_cast %156 : vector<8x256xf32> to vector<1x8x256xf32>
    tpu.vector_store %arg3[%c1_31, %c0_32, %c0_33], %159 {strides = array<i32>} : memref<2x8x256xf32, #tpu.memory_space<vmem>>, vector<1x8x256xf32>,
    return
  }
  func.func @transform_0(%arg0: i32) -> (i32, i32, i32) {
    %c0_i32 = arith.constant 0 : i32
    %c0_i32_0 = arith.constant 0 : i32
    %c0_i32_1 = arith.constant 0 : i32
    return %arg0, %c0_i32, %c0_i32_0 : i32, i32, i32
  }
  func.func @transform_1(%arg0: i32) -> (i32, i32) {
    %c0_i32 = arith.constant 0 : i32
    %c0_i32_0 = arith.constant 0 : i32
    %c0_i32_1 = arith.constant 0 : i32
    return %c0_i32, %c0_i32_0 : i32, i32
  }
  func.func @transform_2(%arg0: i32) -> (i32, i32, i32) {
    %c0_i32 = arith.constant 0 : i32
    %c0_i32_0 = arith.constant 0 : i32
    %c0_i32_1 = arith.constant 0 : i32
    return %arg0, %c0_i32, %c0_i32_0 : i32, i32, i32
  }
}

</mosaic_0001>

<bundles_post_ra>
// kernel: conv_out_pallas.1
= control target key start
LH: loop header
LB: loop body
LE: loop exit
PB: predicated region body
PF: predicated region fallthrough
CT: control target
= control target key end

     0   :  { %v666_v3 = vmov 0.0   ;;  %s667_s14 = smov 17   ;;  %s668_s15 = smov 16   ;;  %vm213_vm2 = vcmask 138240   ;;  %vm259_vm3 = vcmask 7168   ;;  %vm229_vm4 = vcmask 130048   ;;  %s1105_s0 = inlined_call_operand.vmem [shape: f32[2,128,256], index: 0, kind: input, shape index: {}]   ;;  %s1106_s1 = inlined_call_operand.vmem [shape: f32[72,128], index: 1, kind: input, shape index: {}]   ;;  %s1107_s2 = inlined_call_operand.vmem [shape: f32[2,8,256], index: 2, kind: output, shape index: {}]  }
   0x1   :  { %v86_v0 = vld [vmem:[%s1105_s0 + $0xf8] sm:$0xff]  ;;  %v85_v2 = vld [vmem:[%s1105_s0 + $0xf0] sm:$0xff]  ;;  %151 = vmatprep.mubr.f32.mxu0 %v666_v3  ;;  %441 = vmatprep.mubr.f32.mxu1 %v666_v3  ;;  %v84_v5 = vld [vmem:[%s1105_s0 + $0xe8] sm:$0xff]  ;;  %s670_s16 = smov 1   ;;  %s671_s17 = smov 127   ;;  %vm243_vm6 = vcmask 121856  }
   0x2   :  { %v654_v1 = vld [vmem:[%s1105_s0 + $0x1f8] sm:$0xff]  ;;  %87 = vmatprep.subr.mxu0 %v86_v0  ;;  %v653_v4 = vld [vmem:[%s1105_s0 + $0x1f0] sm:$0xff]  ;;  %v652_v6 = vld [vmem:[%s1105_s0 + $0x1e8] sm:$0xff]  ;;  %s672_s18 = smov 113   ;;  %s673_s19 = smov 112   ;;  %vm272_vm10 = vcmask 1039360  }
   0x3   :  { %377 = vmatprep.subr.mxu1 %v654_v1  ;;  %88 = vmatpush1.msra.mxu0 %v85_v2  ;;  %v83_v7 = vld [vmem:[%s1105_s0 + $0xe0] sm:$0xff]  ;;  %v82_v9 = vld [vmem:[%s1105_s0 + $0xd8] sm:$0xff]  ;;  %v81_v11 = vld [vmem:[%s1105_s0 + $0xd0] sm:$0xff]  ;;  %s674_s20 = smov 111   ;;  %vm286_vm12 = vcmask 924672   ;;  %vm302_vm14 = vcmask 916480  }
   0x4   :  { %378 = vmatpush1.msra.mxu1 %v653_v4  ;;  %v651_v8 = vld [vmem:[%s1105_s0 + $0x1e0] sm:$0xff]  ;;  %89 = vmatprep.subr.mxu0 %v84_v5  ;;  %v650_v10 = vld [vmem:[%s1105_s0 + $0x1d8] sm:$0xff]  ;;  %v649_v12 = vld [vmem:[%s1105_s0 + $0x1d0] sm:$0xff]  ;;  %vm316_vm15 = vcmask 908288  }
   0x5   :  { %379 = vmatprep.subr.mxu1 %v652_v6  ;;  %90 = vmatpush1.msra.mxu0 %v83_v7  ;;  %v80_v13 = vld [vmem:[%s1105_s0 + $0xc8] sm:$0xff]  ;;  %v79_v15 = vld [vmem:[%s1105_s0 + $0xc0] sm:$0xff]  ;;  %v78_v17 = vld [vmem:[%s1105_s0 + $0xb8] sm:$0xff] }
   0x6   :  { %380 = vmatpush1.msra.mxu1 %v651_v8  ;;  %v648_v14 = vld [vmem:[%s1105_s0 + $0x1c8] sm:$0xff]  ;;  %91 = vmatprep.subr.mxu0 %v82_v9  ;;  %v647_v16 = vld [vmem:[%s1105_s0 + $0x1c0] sm:$0xff]  ;;  %v646_v18 = vld [vmem:[%s1105_s0 + $0x1b8] sm:$0xff] }
   0x7   :  { %381 = vmatprep.subr.mxu1 %v650_v10  ;;  %92 = vmatpush1.msra.mxu0 %v81_v11  ;;  %v77_v19 = vld [vmem:[%s1105_s0 + $0xb0] sm:$0xff]  ;;  %v76_v21 = vld [vmem:[%s1105_s0 + $0xa8] sm:$0xff]  ;;  %v75_v23 = vld [vmem:[%s1105_s0 + $0xa0] sm:$0xff] }
   0x8   :  { %382 = vmatpush1.msra.mxu1 %v649_v12  ;;  %93 = vmatprep.subr.mxu0 %v80_v13  ;;  %v645_v20 = vld [vmem:[%s1105_s0 + $0x1b0] sm:$0xff]  ;;  %v644_v22 = vld [vmem:[%s1105_s0 + $0x1a8] sm:$0xff]  ;;  %v643_v24 = vld [vmem:[%s1105_s0 + $0x1a0] sm:$0xff] }
   0x9   :  { %383 = vmatprep.subr.mxu1 %v648_v14  ;;  %94 = vmatpush1.msra.mxu0 %v79_v15  ;;  %v74_v25 = vld [vmem:[%s1105_s0 + $0x98] sm:$0xff]  ;;  %v73_v27 = vld [vmem:[%s1105_s0 + $0x90] sm:$0xff]  ;;  %v72_v29 = vld [vmem:[%s1105_s0 + $0x88] sm:$0xff] }
   0xa   :  { %384 = vmatpush1.msra.mxu1 %v647_v16  ;;  %95 = vmatprep.subr.mxu0 %v78_v17  ;;  %v642_v26 = vld [vmem:[%s1105_s0 + $0x198] sm:$0xff]  ;;  %v641_v28 = vld [vmem:[%s1105_s0 + $0x190] sm:$0xff]  ;;  %v640_v30 = vld [vmem:[%s1105_s0 + $0x188] sm:$0xff] }
   0xb   :  { %385 = vmatprep.subr.mxu1 %v646_v18  ;;  %96 = vmatpush1.msra.mxu0 %v77_v19  ;;  %v71_v31 = vld [vmem:[%s1105_s0 + $0x80] sm:$0xff]  ;;  %v70_v33 = vld [vmem:[%s1105_s0 + $0x78] sm:$0xff]  ;;  %v69_v35 = vld [vmem:[%s1105_s0 + $0x70] sm:$0xff] }
   0xc   :  { %386 = vmatpush1.msra.mxu1 %v645_v20  ;;  %97 = vmatprep.subr.mxu0 %v76_v21  ;;  %v639_v32 = vld [vmem:[%s1105_s0 + $0x180] sm:$0xff]  ;;  %v638_v34 = vld [vmem:[%s1105_s0 + $0x178] sm:$0xff]  ;;  %v637_v36 = vld [vmem:[%s1105_s0 + $0x170] sm:$0xff] }
   0xd   :  { %387 = vmatprep.subr.mxu1 %v644_v22  ;;  %98 = vmatpush1.msra.mxu0 %v75_v23  ;;  %v68_v37 = vld [vmem:[%s1105_s0 + $0x68] sm:$0xff]  ;;  %v67_v39 = vld [vmem:[%s1105_s0 + $0x60] sm:$0xff]  ;;  %v66_v41 = vld [vmem:[%s1105_s0 + $0x58] sm:$0xff] }
   0xe   :  { %388 = vmatpush1.msra.mxu1 %v643_v24  ;;  %99 = vmatprep.subr.mxu0 %v74_v25  ;;  %v636_v38 = vld [vmem:[%s1105_s0 + $0x168] sm:$0xff]  ;;  %v635_v40 = vld [vmem:[%s1105_s0 + $0x160] sm:$0xff]  ;;  %v634_v42 = vld [vmem:[%s1105_s0 + $0x158] sm:$0xff] }
   0xf   :  { %389 = vmatprep.subr.mxu1 %v642_v26  ;;  %100 = vmatpush1.msra.mxu0 %v73_v27  ;;  %v65_v43 = vld [vmem:[%s1105_s0 + $0x50] sm:$0xff]  ;;  %v64_v45 = vld [vmem:[%s1105_s0 + $0x48] sm:$0xff]  ;;  %v63_v47 = vld [vmem:[%s1105_s0 + $0x40] sm:$0xff] }
  0x10   :  { %390 = vmatpush1.msra.mxu1 %v641_v28  ;;  %101 = vmatprep.subr.mxu0 %v72_v29  ;;  %v633_v44 = vld [vmem:[%s1105_s0 + $0x150] sm:$0xff]  ;;  %v632_v46 = vld [vmem:[%s1105_s0 + $0x148] sm:$0xff]  ;;  %v631_v48 = vld [vmem:[%s1105_s0 + $0x140] sm:$0xff] }
  0x11   :  { %391 = vmatprep.subr.mxu1 %v640_v30  ;;  %102 = vmatpush1.msra.mxu0 %v71_v31  ;;  %v62_v49 = vld [vmem:[%s1105_s0 + $0x38] sm:$0xff]  ;;  %v61_v51 = vld [vmem:[%s1105_s0 + $0x30] sm:$0xff]  ;;  %v60_v53 = vld [vmem:[%s1105_s0 + $0x28] sm:$0xff] }
  0x12   :  { %392 = vmatpush1.msra.mxu1 %v639_v32  ;;  %103 = vmatprep.subr.mxu0 %v70_v33  ;;  %v630_v50 = vld [vmem:[%s1105_s0 + $0x138] sm:$0xff]  ;;  %v629_v52 = vld [vmem:[%s1105_s0 + $0x130] sm:$0xff]  ;;  %v628_v54 = vld [vmem:[%s1105_s0 + $0x128] sm:$0xff] }
  0x13   :  { %393 = vmatprep.subr.mxu1 %v638_v34  ;;  %104 = vmatpush1.msra.mxu0 %v69_v35  ;;  %v59_v55 = vld [vmem:[%s1105_s0 + $0x20] sm:$0xff]  ;;  %v58_v57 = vld [vmem:[%s1105_s0 + $0x18] sm:$0xff]  ;;  %v57_v59 = vld [vmem:[%s1105_s0 + $0x10] sm:$0xff] }
  0x14   :  { %394 = vmatpush1.msra.mxu1 %v637_v36  ;;  %105 = vmatprep.subr.mxu0 %v68_v37  ;;  %v627_v56 = vld [vmem:[%s1105_s0 + $0x120] sm:$0xff]  ;;  %v626_v58 = vld [vmem:[%s1105_s0 + $0x118] sm:$0xff]  ;;  %v625_v60 = vld [vmem:[%s1105_s0 + $0x110] sm:$0xff] }
  0x15   :  { %395 = vmatprep.subr.mxu1 %v636_v38  ;;  %106 = vmatpush1.msra.mxu0 %v67_v39  ;;  %v56_v61 = vld [vmem:[%s1105_s0 + $0x8] sm:$0xff]  ;;  %v55_v63 = vld [vmem:[%s1105_s0] sm:$0xff]  ;;  %v48_v4 = vld [vmem:[%s1106_s1 + $0x10] sm:$0xff] }
  0x16   :  { %396 = vmatpush1.msra.mxu1 %v635_v40  ;;  %107 = vmatprep.subr.mxu0 %v66_v41  ;;  %v624_v62 = vld [vmem:[%s1105_s0 + $0x108] sm:$0xff]  ;;  %v623_v0 = vld [vmem:[%s1105_s0 + $0x100] sm:$0xff]  ;;  %v49_v5 = vld [vmem:[%s1106_s1 + $0x18] sm:$0xff] }
  0x17   :  { %397 = vmatprep.subr.mxu1 %v634_v42  ;;  %108 = vmatpush1.msra.mxu0 %v65_v43  ;;  %v46_v1 = vld [vmem:[%s1106_s1] sm:$0xff]  ;;  %v47_v2 = vld [vmem:[%s1106_s1 + $0x8] sm:$0xff]  ;;  %v52_v8 = vld [vmem:[%s1106_s1 + $0x30] sm:$0xff] }
  0x18   :  { %398 = vmatpush1.msra.mxu1 %v633_v44  ;;  %109 = vmatprep.subr.mxu0 %v64_v45  ;;  %v50_v6 = vld [vmem:[%s1106_s1 + $0x20] sm:$0xff]  ;;  %v51_v7 = vld [vmem:[%s1106_s1 + $0x28] sm:$0xff]  ;;  %v53_v9 = vld [vmem:[%s1106_s1 + $0x38] sm:$0xff] }
  0x19   :  { %399 = vmatprep.subr.mxu1 %v632_v46  ;;  %110 = vmatpush1.msra.mxu0 %v63_v47  ;;  %v54_v10 = vld [vmem:[%s1106_s1 + $0x40] sm:$0xff]  ;;  %s669_s1 = smov 15  }
  0x1a   :  { %400 = vmatpush1.msra.mxu1 %v631_v48  ;;  %111 = vmatprep.subr.mxu0 %v62_v49 }
  0x1b   :  { %401 = vmatprep.subr.mxu1 %v630_v50  ;;  %112 = vmatpush1.msra.mxu0 %v61_v51 }
  0x1c   :  { %402 = vmatpush1.msra.mxu1 %v629_v52  ;;  %113 = vmatprep.subr.mxu0 %v60_v53 }
  0x1d   :  { %403 = vmatprep.subr.mxu1 %v628_v54  ;;  %114 = vmatpush1.msra.mxu0 %v59_v55 }
  0x1e   :  { %404 = vmatpush1.msra.mxu1 %v627_v56  ;;  %115 = vmatprep.subr.mxu0 %v58_v57 }
  0x1f   :  { %405 = vmatprep.subr.mxu1 %v626_v58  ;;  %116 = vmatpush1.msra.mxu0 %v57_v59  ;;  %v11_v58 = vlaneseq }
  0x20   :  { %406 = vmatpush1.msra.mxu1 %v625_v60  ;;  %117 = vmatprep.subr.mxu0 %v56_v61 }
  0x21   :  { %407 = vmatprep.subr.mxu1 %v624_v62  ;;  %118 = vmatpush1.msra.mxu0 %v55_v63  ;;  %v12_v61 = vand.u32 127, %v11_v58 }
  0x22   :  { %408 = vmatpush1.msra.mxu1 %v623_v0  ;;  %152 = vmatmul.mubr.f32.vlgmr.msra.gmra.mxu0 %v46_v1 }
  0x23   :  { %442 = vmatmul.mubr.f32.vlgmr.msra.gmra.mxu1 %v46_v1  ;;  %157 = vmatprep.mubr.f32.mxu0 %v666_v3  ;;  %v941_v0 = vadd.s32 128, %v12_v61  ;;  %v18_v1 = vand.u32 15, %v12_v61  ;;  %vm38_vm0 = vcmp.ge.s32.totalorder %v12_v61, 16 }
  0x24   :  { %447 = vmatprep.mubr.f32.mxu1 %v666_v3 }
  0x25   :  { %vm944_vm1 = vcmp.ne.s32.totalorder %v18_v1, 0  ;;  %vm948_vm5 = vcmp.ne.s32.totalorder %v18_v1, 15  ;;  %vm41_vm11 = vcmp.lt.s32.totalorder %v941_v0, 240 }
  0x26   :  { %158 = vmatmul.mubr.f32.gmra.mxu0 %v47_v2  ;;  %vm959_vm8 = vmand %vm38_vm0, %vm944_vm1 }
  0x27   :  { %448 = vmatmul.mubr.f32.gmra.mxu1 %v47_v2  ;;  %163 = vmatprep.mubr.f32.mxu0 %v666_v3  ;;  %vm975_vm13 = vmand %vm38_vm0, %vm948_vm5 }
  0x28   :  { %453 = vmatprep.mubr.f32.mxu1 %v666_v3 }
  0x2a   :  { %164 = vmatmul.mubr.f32.gmra.mxu0 %v48_v4 }
  0x2b   :  { %454 = vmatmul.mubr.f32.gmra.mxu1 %v48_v4  ;;  %169 = vmatprep.mubr.f32.mxu0 %v666_v3 }
  0x2c   :  { %459 = vmatprep.mubr.f32.mxu1 %v666_v3 }
  0x2e   :  { %170 = vmatmul.mubr.f32.gmra.mxu0 %v49_v5 }
  0x2f   :  { %460 = vmatmul.mubr.f32.gmra.mxu1 %v49_v5  ;;  %175 = vmatprep.mubr.f32.mxu0 %v666_v3  ;;  %v25_v5 = vand.u32 15, %v941_v0 }
  0x30   :  { %465 = vmatprep.mubr.f32.mxu1 %v666_v3 }
  0x31   :  { %vm952_vm7 = vcmp.ne.s32.totalorder %v25_v5, 0  ;;  %vm966_vm9 = vcmp.ne.s32.totalorder %v25_v5, 15 }
  0x32   :  { %176 = vmatmul.mubr.f32.gmra.mxu0 %v50_v6 }
  0x33   :  { %466 = vmatmul.mubr.f32.gmra.mxu1 %v50_v6  ;;  %181 = vmatprep.mubr.f32.mxu0 %v666_v3 }
  0x34   :  { %471 = vmatprep.mubr.f32.mxu1 %v666_v3 }
  0x36   :  { %182 = vmatmul.mubr.f32.gmra.mxu0 %v51_v7 }
  0x37   :  { %472 = vmatmul.mubr.f32.gmra.mxu1 %v51_v7  ;;  %187 = vmatprep.mubr.f32.mxu0 %v666_v3 }
  0x38   :  { %477 = vmatprep.mubr.f32.mxu1 %v666_v3 }
  0x3a   :  { %188 = vmatmul.mubr.f32.gmra.mxu0 %v52_v8 }
  0x3b   :  { %478 = vmatmul.mubr.f32.gmra.mxu1 %v52_v8  ;;  %193 = vmatprep.mubr.f32.mxu0 %v666_v3 }
  0x3c   :  { %483 = vmatprep.mubr.f32.mxu1 %v666_v3 }
  0x3e   :  { %194 = vmatmul.mubr.f32.gmra.mxu0 %v53_v9 }
  0x3f   :  { %484 = vmatmul.mubr.f32.gmra.mxu1 %v53_v9  ;;  %199 = vmatprep.mubr.f32.mxu0 %v666_v3 }
  0x40   :  { %489 = vmatprep.mubr.f32.mxu1 %v666_v3 }
  0x42   :  { %200 = vmatmul.mubr.f32.gmra.mxu0 %v54_v10 }
  0x43   :  { %490 = vmatmul.mubr.f32.gmra.mxu1 %v54_v10 }
  0xe2   :  { %v153_v11 = vpop.f32.mrf.mxu0 }
  0xe3   :  { %v443_v12 = vpop.f32.mrf.mxu1  ;;  %211 = vrot.lane.b32.xlu0 %v153_v11, %s667_s14 }
  0xe4   :  { %501 = vrot.lane.b32.xlu1 %v443_v12, %s667_s14  ;;  %v155_v13 = vpop.f32.mrf.mxu0 }
  0xe5   :  { %v445_v14 = vpop.f32.mrf.mxu1 }
  0xe6   :  { %v159_v15 = vpop.f32.mrf.mxu0 }
  0xe7   :  { %v449_v16 = vpop.f32.mrf.mxu1  ;;  %207 = vrot.lane.b32.xlu0 %v155_v13, %s667_s14 }
  0xe8   :  { %227 = vrot.lane.b32.xlu1 %v159_v15, %s668_s15  ;;  %v161_v17 = vpop.f32.mrf.mxu0 }
  0xe9   :  { %v451_v18 = vpop.f32.mrf.mxu1 }
  0xea   :  { %v165_v19 = vpop.f32.mrf.mxu0 }
  0xeb   :  { %497 = vrot.lane.b32.xlu0 %v445_v14, %s667_s14  ;;  %v455_v20 = vpop.f32.mrf.mxu1 }
  0xec   :  { %514 = vrot.lane.b32.xlu1 %v449_v16, %s668_s15  ;;  %v167_v3 = vpop.f32.mrf.mxu0 }
  0xed   :  { %v457_v22 = vpop.f32.mrf.mxu1 }
  0xee   :  { %v171_v21 = vpop.f32.mrf.mxu0 }
  0xef   :  { %510 = vrot.lane.b32.xlu0 %v451_v18, %s668_s15  ;;  %v461_v24 = vpop.f32.mrf.mxu1 }
  0xf0   :  { %223 = vrot.lane.b32.xlu1 %v161_v17, %s668_s15  ;;  %v173_v23 = vpop.f32.mrf.mxu0 }
  0xf1   :  { %v463_v26 = vpop.f32.mrf.mxu1 }
  0xf2   :  { %v927_v25 = vpop.f32.mrf.mxu0 }
  0xf3   :  { %237 = vrot.lane.b32.xlu0 %v167_v3, %s669_s1  ;;  %v931_v28 = vpop.f32.mrf.mxu1 }
  0xf4   :  { %241 = vrot.lane.b32.xlu1 %v165_v19, %s669_s1  ;;  %v929_v27 = vpop.f32.mrf.mxu0 }
  0xf5   :  { %v933_v30 = vpop.f32.mrf.mxu1 }
  0xf6   :  { %v183_v29 = vpop.f32.mrf.mxu0 }
  0xf7   :  { %523 = vrot.lane.b32.xlu0 %v457_v22, %s669_s1  ;;  %v473_v32 = vpop.f32.mrf.mxu1 }
  0xf8   :  { %527 = vrot.lane.b32.xlu1 %v455_v20, %s669_s1  ;;  %v185_v31 = vpop.f32.mrf.mxu0 }
  0xf9   :  { %v475_v33 = vpop.f32.mrf.mxu1 }
  0xfa   :  { %v189_v34 = vpop.f32.mrf.mxu0 }
  0xfb   :  { %253 = vrot.lane.b32.xlu0 %v173_v23, %s670_s16  ;;  %v479_v36 = vpop.f32.mrf.mxu1 }
  0xfc   :  { %257 = vrot.lane.b32.xlu1 %v171_v21, %s670_s16  ;;  %v191_v35 = vpop.f32.mrf.mxu0 }
  0xfd   :  { %v481_v37 = vpop.f32.mrf.mxu1 }
  0xfe   :  { %v195_v38 = vpop.f32.mrf.mxu0 }
  0xff   :  { %536 = vrot.lane.b32.xlu0 %v463_v26, %s670_s16  ;;  %v485_v40 = vpop.f32.mrf.mxu1 }
 0x100   :  { %540 = vrot.lane.b32.xlu1 %v461_v24, %s670_s16  ;;  %v197_v39 = vpop.f32.mrf.mxu0 }
 0x101   :  { %v487_v41 = vpop.f32.mrf.mxu1 }
 0x102   :  { %v201_v42 = vpop.f32.mrf.mxu0 }
 0x103   :  { %268 = vrot.lane.b32.xlu0 %v183_v29, %s671_s17  ;;  %v491_v44 = vpop.f32.mrf.mxu1 }
 0x104   :  { %270 = vrot.lane.b32.xlu1 %v185_v31, %s671_s17  ;;  %v203_v43 = vpop.f32.mrf.mxu0 }
 0x105   :  { %v493_v45 = vpop.f32.mrf.mxu1 }
 0x107   :  { %550 = vrot.lane.b32.xlu0 %v473_v32, %s671_s17 }
 0x108   :  { %552 = vrot.lane.b32.xlu1 %v475_v33, %s671_s17 }
 0x10b   :  { %282 = vrot.lane.b32.xlu0 %v189_v34, %s672_s18 }
 0x10c   :  { %284 = vrot.lane.b32.xlu1 %v191_v35, %s672_s18 }
 0x10f   :  { %563 = vrot.lane.b32.xlu0 %v479_v36, %s672_s18 }
 0x110   :  { %565 = vrot.lane.b32.xlu1 %v481_v37, %s672_s18 }
 0x113   :  { %298 = vrot.lane.b32.xlu0 %v195_v38, %s673_s19 }
 0x114   :  { %300 = vrot.lane.b32.xlu1 %v197_v39, %s673_s19 }
 0x117   :  { %576 = vrot.lane.b32.xlu0 %v485_v40, %s673_s19 }
 0x118   :  { %578 = vrot.lane.b32.xlu1 %v487_v41, %s673_s19 }
 0x11b   :  { %312 = vrot.lane.b32.xlu0 %v201_v42, %s674_s20 }
 0x11c   :  { %314 = vrot.lane.b32.xlu1 %v203_v43, %s674_s20 }
 0x11f   :  { %589 = vrot.lane.b32.xlu0 %v491_v44, %s674_s20 }
 0x120   :  { %591 = vrot.lane.b32.xlu1 %v493_v45, %s674_s20 }
 0x155   :  { %v212_v47 = vpop.permute.xlu0 %211 }
 0x156   :  { %v502_v46 = vpop.permute.xlu1 %501 }
 0x159   :  { %v208_v48 = vpop.permute.xlu0 %207 }
 0x15a   :  { %v228_v49 = vpop.permute.xlu1 %227  ;;  %v217_v12 = vsel %vm213_vm2, %v208_v48, %v212_v47  ;;  %v214_v3 = vsel %vm213_vm2, %v212_v47, %v208_v48 }
 0x15b   :  { %v220_v20 = vsel %vm959_vm8, %v217_v12, 0.0  ;;  %v221_v41 = vsel %vm952_vm7, %v214_v3, 0.0 }
 0x15d   :  { %v498_v50 = vpop.permute.xlu0 %497 }
 0x15e   :  { %v935_v51 = vpop.permute.xlu1 %514  ;;  %v989_v26 = vsel %vm213_vm2, %v502_v46, %v498_v50  ;;  %v992_v29 = vsel %vm213_vm2, %v498_v50, %v502_v46 }
 0x15f   :  { %v507_v42 = vsel %vm959_vm8, %v992_v29, 0.0  ;;  %v508_v43 = vsel %vm952_vm7, %v989_v26, 0.0 }
 0x161   :  { %v511_v52 = vpop.permute.xlu0 %510 }
 0x162   :  { %v224_v53 = vpop.permute.xlu1 %223  ;;  %v519_v31 = vsel %vm229_vm4, %v511_v52, %v935_v51  ;;  %v516_v44 = vsel %vm229_vm4, %v935_v51, %v511_v52 }
 0x163   :  { %v233_v16 = vsel %vm229_vm4, %v224_v53, %v228_v49  ;;  %v230_v32 = vsel %vm229_vm4, %v228_v49, %v224_v53  ;;  %v520_v53 = vsel %vm38_vm0, %v519_v31, 0.0 }
 0x164   :  { %v234_v33 = vsel %vm38_vm0, %v233_v16, 0.0  ;;  %v327_v48 = vadd.f32 %v230_v32, %v221_v41  ;;  %vm1031_vm0 = vmand %vm41_vm11, %vm952_vm7 }
 0x165   :  { %v238_v55 = vpop.permute.xlu0 %237  ;;  %v326_v47 = vadd.f32 %v234_v33, %v220_v20 }
 0x166   :  { %v242_v54 = vpop.permute.xlu1 %241 }
 0x167   :  { %v244_v18 = vsel %vm243_vm6, %v242_v54, %v238_v55  ;;  %v247_v19 = vsel %vm243_vm6, %v238_v55, %v242_v54 }
 0x168   :  { %v250_v34 = vsel %vm975_vm13, %v247_v19, 0.0  ;;  %v251_v35 = vsel %vm966_vm9, %v244_v18, 0.0 }
 0x169   :  { %v524_v57 = vpop.permute.xlu0 %523 }
 0x16a   :  { %v528_v56 = vpop.permute.xlu1 %527 }
 0x16b   :  { %v529_v37 = vsel %vm243_vm6, %v528_v56, %v524_v57  ;;  %v532_v38 = vsel %vm243_vm6, %v524_v57, %v528_v56 }
 0x16c   :  { %v533_v54 = vsel %vm975_vm13, %v532_v38, 0.0  ;;  %v534_v55 = vsel %vm966_vm9, %v529_v37, 0.0  ;;  %v600_v38 = vadd.f32 %v520_v53, %v507_v42 }
 0x16d   :  { %v254_v60 = vpop.permute.xlu0 %253 }
 0x16e   :  { %v258_v59 = vpop.permute.xlu1 %257 }
 0x16f   :  { %v260_v13 = vsel %vm259_vm3, %v258_v59, %v254_v60  ;;  %v263_v14 = vsel %vm259_vm3, %v254_v60, %v258_v59 }
 0x170   :  { %v264_v21 = vsel %vm944_vm1, %v263_v14, 0.0  ;;  %v265_v22 = vsel %vm952_vm7, %v260_v13, 0.0 }
 0x171   :  { %v939_v63 = vpop.permute.xlu0 %536  ;;  %v328_v39 = vadd.f32 %v264_v21, %v250_v34  ;;  %v329_v40 = vadd.f32 %v265_v22, %v251_v35 }
 0x172   :  { %v937_v62 = vpop.permute.xlu1 %540 }
 0x173   :  { %v334_v51 = vadd.f32 %v328_v39, %v326_v47  ;;  %v335_v52 = vadd.f32 %v329_v40, %v327_v48  ;;  %v542_v57 = vsel %vm259_vm3, %v937_v62, %v939_v63  ;;  %v545_v60 = vsel %vm259_vm3, %v939_v63, %v937_v62 }
 0x174   :  { %v546_v17 = vsel %vm944_vm1, %v545_v60, 0.0  ;;  %v547_v19 = vsel %vm952_vm7, %v542_v57, 0.0  ;;  %v601_v39 = vadd.f32 %v516_v44, %v508_v43 }
 0x175   :  { %v269_v2 = vpop.permute.xlu0 %268  ;;  %v602_v31 = vadd.f32 %v546_v17, %v533_v54  ;;  %v603_v34 = vadd.f32 %v547_v19, %v534_v55 }
 0x176   :  { %v271_v4 = vpop.permute.xlu1 %270 }
 0x177   :  { %v273_v36 = vsel %vm272_vm10, %v269_v2, %v271_v4  ;;  %v277_v49 = vsel %vm272_vm10, %v271_v4, %v269_v2 }
 0x178   :  { %v278_v50 = vsel %vm948_vm5, %v273_v36, 0.0  ;;  %v279_v61 = vsel %vm966_vm9, %v277_v49, 0.0  ;;  %v608_v49 = vadd.f32 %v602_v31, %v600_v38 }
 0x179   :  { %v551_v8 = vpop.permute.xlu0 %550  ;;  %v330_v1 = vadd.f32 %v278_v50, %v927_v25  ;;  %v609_v50 = vadd.f32 %v603_v34, %v601_v39 }
 0x17a   :  { %v553_v9 = vpop.permute.xlu1 %552 }
 0x17b   :  { %v554_v2 = vsel %vm272_vm10, %v551_v8, %v553_v9  ;;  %v558_v11 = vsel %vm272_vm10, %v553_v9, %v551_v8  ;;  %v331_v8 = vadd.f32 %v279_v61, %v929_v27 }
 0x17c   :  { %v559_v3 = vsel %vm948_vm5, %v554_v2, 0.0  ;;  %v560_v20 = vsel %vm966_vm9, %v558_v11, 0.0 }
 0x17d   :  { %v283_v23 = vpop.permute.xlu0 %282  ;;  %v604_v35 = vadd.f32 %v559_v3, %v931_v28  ;;  %v605_v36 = vadd.f32 %v560_v20, %v933_v30 }
 0x17e   :  { %v285_v24 = vpop.permute.xlu1 %284 }
 0x17f   :  { %v287_v56 = vsel %vm286_vm12, %v283_v23, %v285_v24  ;;  %v291_v59 = vsel %vm286_vm12, %v285_v24, %v283_v23 }
 0x180   :  { %v294_v12 = vsel %vm944_vm1, %v287_v56, 0.0  ;;  %v295_v62 = vsel %vm1031_vm0, %v291_v59, 0.0 }
 0x181   :  { %v564_v45 = vpop.permute.xlu0 %563 }
 0x182   :  { %v566_v46 = vpop.permute.xlu1 %565 }
 0x183   :  { %v567_v63 = vsel %vm286_vm12, %v564_v45, %v566_v46  ;;  %v571_v9 = vsel %vm286_vm12, %v566_v46, %v564_v45 }
 0x184   :  { %v572_v24 = vsel %vm944_vm1, %v567_v63, 0.0  ;;  %v573_v10 = vsel %vm1031_vm0, %v571_v9, 0.0  ;;  %vm1077_vm1 = vmand %vm41_vm11, %vm966_vm9 }
 0x185   :  { %v299_v4 = vpop.permute.xlu0 %298 }
 0x186   :  { %v301_v5 = vpop.permute.xlu1 %300 }
 0x187   :  { %v303_v13 = vsel %vm302_vm14, %v299_v4, %v301_v5  ;;  %v307_v14 = vsel %vm302_vm14, %v301_v5, %v299_v4 }
 0x188   :  { %v309_v25 = vsel %vm41_vm11, %v307_v14, 0.0  ;;  %v332_v16 = vadd.f32 %v303_v13, %v294_v12 }
 0x189   :  { %v333_v18 = vadd.f32 %v309_v25, %v295_v62  ;;  %v577_v22 = vpop.permute.xlu0 %576 }
 0x18a   :  { %v336_v21 = vadd.f32 %v332_v16, %v330_v1  ;;  %v579_v23 = vpop.permute.xlu1 %578 }
 0x18b   :  { %v337_v26 = vadd.f32 %v333_v18, %v331_v8  ;;  %v580_v27 = vsel %vm302_vm14, %v577_v22, %v579_v23  ;;  %v584_v29 = vsel %vm302_vm14, %v579_v23, %v577_v22 }
 0x18c   :  { %v586_v32 = vsel %vm41_vm11, %v584_v29, 0.0  ;;  %v606_v33 = vadd.f32 %v580_v27, %v572_v24  ;;  %v338_v41 = vadd.f32 %v336_v21, %v334_v51 }
 0x18d   :  { %v607_v6 = vadd.f32 %v586_v32, %v573_v10  ;;  %v313_v40 = vpop.permute.xlu0 %312  ;;  %v339_v45 = vadd.f32 %v337_v26, %v335_v52 }
 0x18e   :  { %v315_v46 = vpop.permute.xlu1 %314  ;;  %v610_v47 = vadd.f32 %v606_v33, %v604_v35 }
 0x18f   :  { %v611_v48 = vadd.f32 %v607_v6, %v605_v36  ;;  %v317_v28 = vsel %vm316_vm15, %v313_v40, %v315_v46  ;;  %v321_v30 = vsel %vm316_vm15, %v315_v46, %v313_v40 }
 0x190   :  { %v324_v15 = vsel %vm948_vm5, %v317_v28, 0.0  ;;  %v325_v0 = vsel %vm1077_vm1, %v321_v30, 0.0  ;;  %v612_v54 = vadd.f32 %v610_v47, %v608_v49 }
 0x191   :  { %v340_v42 = vadd.f32 %v338_v41, %v324_v15  ;;  %v341_v43 = vadd.f32 %v339_v45, %v325_v0  ;;  %v590_v44 = vpop.permute.xlu0 %589  ;;  %v613_v55 = vadd.f32 %v611_v48, %v609_v50 }
 0x192   :  { %v592_v53 = vpop.permute.xlu1 %591 }
 0x193   :  { %342 = vst [vmem:[%s1107_s2] sm:$0xff] %v340_v42  ;;  %343 = vst [vmem:[%s1107_s2 + $0x8] sm:$0xff] %v341_v43  ;;  %v593_v56 = vsel %vm316_vm15, %v590_v44, %v592_v53  ;;  %v597_v51 = vsel %vm316_vm15, %v592_v53, %v590_v44 }
 0x194   :  { %v598_v52 = vsel %vm948_vm5, %v593_v56, 0.0  ;;  %v599_v57 = vsel %vm1077_vm1, %v597_v51, 0.0 }
 0x195   :  { %v614_v58 = vadd.f32 %v612_v54, %v598_v52  ;;  %v615_v59 = vadd.f32 %v613_v55, %v599_v57 }
 0x197   :  { %655 = vst [vmem:[%s1107_s2 + $0x10] sm:$0xff] %v614_v58  ;;  %656 = vst [vmem:[%s1107_s2 + $0x18] sm:$0xff] %v615_v59 }

</bundles_post_ra>
